<compile_context>
chip_gen: v7x
topology: tpu7x:2x2x1
jax: 0.10.0
libtpu: 0.0.40
codegen_flags: <defaults>
</compile_context>

<pallas_src>
import jax
import jax.numpy as jnp
from jax.experimental import pallas as pl
from jax.experimental.pallas import tpu as pltpu

_LANES = 128          # vreg lane width
_MAX_BLOCK_ROWS = 512 # 512 x 128 f32 = 256 KiB per output buffer


def _point_input_fill_kernel(val_ref, out_ref):
    # val_ref: SMEM scalar (shape (1,)); out_ref: VMEM (block_rows, 128) tile.
    # Single scalar read -> full-tile broadcast store (unmasked, lane-dense).
    out_ref[...] = jnp.full(out_ref.shape, val_ref[0], dtype=out_ref.dtype)


def point_input_forward(point_stack, val, p=0):
    """Pallas implementation of PointInput.forward.

    point_stack: sequence of dicts, each with key "p" -> (N, 3) coords.
    Returns (data, point_stack) with data = ones((N, 1, 1), float32) * val.
    Note: the reference module hard-codes self.p = 0 regardless of ctor arg.
    """
    in_p = point_stack[0]["p"]            # self.p is forced to 0 in __init__
    n = int(in_p.shape[0])

    # --- lane-dense padded layout: (padded_rows, 128) f32, rows % 8 == 0 ---
    rows = -(-n // _LANES)                            # ceil(n / 128)
    rows = max(8, -(-rows // 8) * 8)                  # round up to sublane mult
    if rows > _MAX_BLOCK_ROWS:
        block_rows = _MAX_BLOCK_ROWS
        rows = -(-rows // block_rows) * block_rows    # pad rows to block mult
    else:
        block_rows = rows
    grid = (rows // block_rows,)

    # float32 to match torch.ones(...) * val reference (silently downcasts f64).
    val_arr = jnp.asarray([val], dtype=jnp.float32)

    padded = pl.pallas_call(
        _point_input_fill_kernel,
        out_shape=jax.ShapeDtypeStruct((rows, _LANES), jnp.float32),
        grid=grid,
        in_specs=[pl.BlockSpec(memory_space=pltpu.SMEM)],
        out_specs=pl.BlockSpec((block_rows, _LANES), lambda i: (i, 0)),
        compiler_params=pltpu.CompilerParams(
            dimension_semantics=("parallel",),
        ),
    )(val_arr)

    # Metadata-only in practice: XLA fuses the slice+reshape into the consumer.
    data = padded.reshape(-1)[:n].reshape(n, 1, 1)
    return data, point_stack


if __name__ == "__main__":
    key = jax.random.PRNGKey(0)
    k0, k1 = jax.random.split(key)

    # Small synthetic point stack: two levels of point clouds, (N, 3) coords.
    n_points = 16
    point_stack = [
        {"p": jax.random.normal(k0, (n_points, 3), dtype=jnp.float32)},
        {"p": jax.random.normal(k1, (n_points // 2, 3), dtype=jnp.float32)},
    ]
    val = 2.5

    data, out_stack = point_input_forward(point_stack, val, p=0)
    data = jax.block_until_ready(data)

    # Correctness check against the reference semantics.
    expected = jnp.ones((n_points, 1, 1), dtype=jnp.float32) * val
    assert data.shape == (n_points, 1, 1), data.shape
    assert data.dtype == jnp.float32, data.dtype
    assert jnp.allclose(data, expected), "mismatch vs reference constant fill"
    assert out_stack is point_stack  # point_stack passed through untouched

    # Also exercise a larger N to hit the tiled / multi-block path.
    n_big = 70000  # -> rows padded to a multiple of 512, grid > 1
    big_stack = [{"p": jnp.zeros((n_big, 3), dtype=jnp.float32)}]
    big_data, _ = point_input_forward(big_stack, -1.25)
    big_data = jax.block_until_ready(big_data)
    assert big_data.shape == (n_big, 1, 1)
    assert jnp.allclose(big_data, -1.25)

    print("KERNEL_OK")
</pallas_src>

<mosaic_0001>
module attributes {stable_mosaic.version = 11 : i64} {
  func.func @_point_input_fill_kernel(%arg0: i32, %arg1: memref<1xf32, #tpu.memory_space<smem>>, %arg2: memref<8x128xf32, #tpu.memory_space<vmem>>) attributes {dimension_semantics = [#tpu.dimension_semantics<parallel>], iteration_bounds = array<i64: 1>, scalar_prefetch = 0 : i64, scratch_operands = 0 : i64, tpu.core_type = #tpu.core_type<tc>, window_params = [{transform_indices = @transform_0, window_bounds = array<i64: 1>}, {transform_indices = @transform_1, window_bounds = array<i64: 8, 128>}]} {
    %c0 = arith.constant 0 : index
    %0 = memref.load %arg1[%c0] : memref<1xf32, #tpu.memory_space<smem>>
    %1 = vector.broadcast %0 : f32 to vector<8x128xf32>
    %c0_0 = arith.constant 0 : index
    %c0_1 = arith.constant 0 : index
    %2 = vector.load %arg2[%c0_0, %c0_1] : memref<8x128xf32, #tpu.memory_space<vmem>>, vector<8x128xf32>
    tpu.vector_store %arg2[%c0_0, %c0_1], %1 {strides = array<i32>} : memref<8x128xf32, #tpu.memory_space<vmem>>, vector<8x128xf32>,
    return
  }
  func.func @transform_0(%arg0: i32) -> i32 {
    %c0_i32 = arith.constant 0 : i32
    %c0_i32_0 = arith.constant 0 : i32
    return %c0_i32 : i32
  }
  func.func @transform_1(%arg0: i32) -> (i32, i32) {
    %c0_i32 = arith.constant 0 : i32
    %c0_i32_0 = arith.constant 0 : i32
    return %arg0, %c0_i32 : i32, i32
  }
}

</mosaic_0001>

<bundles_post_ra>
// kernel: tpu_custom_call.1
= control target key start
LH: loop header
LB: loop body
LE: loop exit
PB: predicated region body
PF: predicated region fallthrough
CT: control target
= control target key end

     0   :  { %s78_s0 = inlined_call_operand.<no memory space> [shape: f32[1], index: 0, kind: input, shape index: {}]   ;;  %s79_s1 = inlined_call_operand.hbm [shape: f32[8,128], index: 1, kind: output, shape index: {}]  }
   0x1   :  { %v11_v0 = vstv %s78_s0 }
   0x2   :  { %7 = vsyncpa [#allocation4], 0  ;;  %12 = vst [vmem:[#allocation3] sm:$0xff] %v11_v0  ;;  %s52_s8 = smov [#allocation3]  }
   0x3   :  { %s19_s9 = sshll.u32 %s52_s8, 4  ;;  %s20_s9 = int_to_ptr.vmem [resolvable:$true] %s19_s9 }
   0x4   :  { %s28_s10 = scalar_lea.vmem %s20_s9, 128  ;;  %p33_p1 = scmp.lt.s32.totalorder %s20_s9, %s20_s9 }
   0x5   :  { %p29_p0 = scmp.ne.s32.totalorder %s20_s9, %s28_s10  ;;  %p34_p2 = scmp.lt.s32.totalorder %s28_s10, %s28_s10 }
   0x7   :  { %p35_p3 = por %p34_p2, %p33_p1 }
   0x9   :  { %p36_p4 = pnand %p35_p3, %p29_p0 }
   0xb   :  { %39 = shalt.err (!%p36_p4)
}
   0xc   :  { %s40_s13 = scalar_lea.hbm %s79_s1, 128 }
   0xd   :  { %p41_p5 = scmp.ne.s32.totalorder %s79_s1, %s40_s13  ;;  %p44_p6 = scmp.lt.u32.totalorder %s40_s13, %s79_s1 }
   0xf   :  { %p46_p7 = pnand %p44_p6, %p41_p5 }
  0x11   :  { %49 = shalt.err (!%p46_p7)
}
  0x12   :  { %22 = dma.vmem_to_hbm [thread:$0]  %s20_s9, 128, %s79_s1, [#allocation4]  }
  0x13   :  { %50 = dma.done.wait [#allocation4], 128  }
  0x14   :  { %51 = vsyncadd [#allocation4], 4294967168 }
  0x15   :  { %26 = vsyncpa [#allocation4], 1 }

</bundles_post_ra>
